<compile_context>
chip_gen: v6e
topology: v6e:2x2x1
jax: 0.10.0
libtpu: 0.0.40
codegen_flags: <defaults>
</compile_context>

<pallas_src>
import functools

import jax
import jax.numpy as jnp
from jax import lax
from jax.experimental import pallas as pl
from jax.experimental.pallas import tpu as pltpu


def _round_up(x, m):
    return ((x + m - 1) // m) * m


def _cdiv(a, b):
    return -(-a // b)


def _tpu_caps():
    """(per-core VMEM capacity bytes, TensorCores per chip), with safe fallbacks."""
    vmem_cap = 128 << 20
    num_cores = 1
    try:
        info = pltpu.get_tpu_info()
        vmem_cap = int(getattr(info, "vmem_capacity_bytes", vmem_cap))
        for name in ("num_cores", "tensorcore_count", "num_tensorcores", "core_count"):
            v = getattr(info, name, None)
            if v:
                num_cores = int(v)
                break
    except Exception:
        pass
    return vmem_cap, num_cores


def hint_loss_kernel(fs_ref, wt_ref, b_ref, ft_ref, out_ref, acc_ref, *,
                     total_rows, tb, steps, needs_mask):
    """Grid = (parallel_batch_slice, dout_slice, batch_tile_step).

    fs_ref : (tb, Din)       tile of student features
    wt_ref : (Din, tn)       slice of transposed weight (resident across g)
    b_ref  : (1, tn)         bias slice
    ft_ref : (tb, tn)        tile of teacher features
    out_ref: (1, 1, 8, 128)  per-(p, j) partial squared-error sum (broadcast)
    acc_ref: (1, tn)         per-lane accumulator (sublane-reduced each step)
    """
    p = pl.program_id(0)   # batch parallel slice (megacore-shardable)
    g = pl.program_id(2)   # reduction step over batch tiles (innermost)

    @pl.when(g == 0)
    def _():
        acc_ref[...] = jnp.zeros_like(acc_ref)

    # Linear layer on the MXU with f32 accumulation.
    y = jnp.dot(fs_ref[...], wt_ref[...], preferred_element_type=jnp.float32)
    y = y + b_ref[...].astype(jnp.float32)

    d = y - ft_ref[...].astype(jnp.float32)
    sq = d * d

    if needs_mask:
        row0 = (p * steps + g) * tb

        # Only the tile that straddles (or lies past) total_rows pays the mask.
        @pl.when(row0 + tb > total_rows)
        def _():
            rows = row0 + lax.broadcasted_iota(jnp.int32, sq.shape, 0)
            sqm = jnp.where(rows < total_rows, sq, 0.0)
            acc_ref[...] = acc_ref[...] + jnp.sum(sqm, axis=0, keepdims=True)

        @pl.when(row0 + tb <= total_rows)
        def _():
            acc_ref[...] = acc_ref[...] + jnp.sum(sq, axis=0, keepdims=True)
    else:
        acc_ref[...] = acc_ref[...] + jnp.sum(sq, axis=0, keepdims=True)

    @pl.when(g == pl.num_programs(2) - 1)
    def _():
        total = jnp.sum(acc_ref[...])
        out_ref[...] = jnp.zeros(out_ref.shape, jnp.float32) + total


def hint_loss(f_s, f_t, w_t, b, *, tb=None, compute_dtype=None):
    """loss = mean((f_s @ w_t + b - f_t)**2), computed in a Pallas kernel.

    w_t is the nn.Linear weight stored as [dim_in, dim_out] (transposed once at
    parameter-setup time, not per call).  compute_dtype=jnp.bfloat16 casts the
    streamed operands (f_s, w_t, f_t) for the HBM-bound fast path while keeping
    f32 accumulation.
    """
    B, Din = f_s.shape
    Din2, Dout = w_t.shape
    assert Din == Din2 and f_t.shape == (B, Dout) and b.shape == (Dout,)

    if compute_dtype is not None:
        f_s = f_s.astype(compute_dtype)
        w_t = w_t.astype(compute_dtype)
        f_t = f_t.astype(compute_dtype)

    fs_item = jnp.dtype(f_s.dtype).itemsize
    w_item = jnp.dtype(w_t.dtype).itemsize
    ft_item = jnp.dtype(f_t.dtype).itemsize

    vmem_cap, num_cores = _tpu_caps()
    # ~48 MiB on v7x (64 MiB VMEM/core), ~96 MiB on v5e/v6e (128 MiB).
    budget = max(32 << 20, min((vmem_cap * 3) // 4, 100 << 20))

    # ---------------- Dout (lane) tiling ----------------
    Dout_p = _round_up(Dout, 128)
    whole_w_bytes = Din * Dout_p * w_item
    weight_dominant = whole_w_bytes > B * Din * fs_item

    if whole_w_bytes <= min(28 << 20, budget // 3):
        tn = Dout_p                                   # whole weight resident
    else:
        max_w_tile = min(12 << 20, budget // 5)       # double-buffered tiles
        tn = max(128, ((max_w_tile // (Din * w_item)) // 128) * 128)
        tn = min(tn, Dout_p)
    nj = _cdiv(Dout_p, tn)
    # Balance tile size so the padded tail slice is as small as possible.
    tn = _round_up(_cdiv(Dout_p, nj), 128)
    nj = _cdiv(Dout_p, tn)

    # Weight-dominant small-batch shapes on multi-TC chips: shard the weight
    # over Dout across cores instead of duplicating it per core.
    if num_cores >= 2 and weight_dominant and Dout_p >= 256 and nj < num_cores:
        tn = _round_up(_cdiv(Dout_p, num_cores), 128)
        nj = _cdiv(Dout_p, tn)

    w_bufs = 1 if nj == 1 else 2
    Dout_pad = nj * tn
    if Dout_pad != Dout:
        # Zero-padded columns contribute exactly 0 to the squared-error sum.
        w_t = jnp.pad(w_t, ((0, 0), (0, Dout_pad - Dout)))
        b = jnp.pad(b, (0, Dout_pad - Dout))
        f_t = jnp.pad(f_t, ((0, 0), (0, Dout_pad - Dout)))
    b2 = b.reshape(1, Dout_pad).astype(jnp.float32)

    # ---------------- batch (sublane) tiling ----------------
    sub = 16 if fs_item == 2 else 8                   # bf16 sublane packing
    resident = (w_bufs * Din * tn * w_item            # weight buffer(s)
                + 2 * 8 * tn * 4                      # bias (padded sublanes) x2
                + 8 * tn * 4                          # accumulator (padded)
                + 2 * 8 * 128 * 4                     # output blocks
                + (2 << 20))                          # headroom
    per_row = 2 * Din * fs_item + 2 * tn * ft_item    # double-buffered f_s + f_t
    avail = max(budget - resident, 0)
    tb_fit = max(sub, ((avail // per_row) // sub) * sub)
    tb_cap = max(sub, min(512 if budget >= (80 << 20) else 256, tb_fit))

    auto_tb = tb is None
    if auto_tb:
        tb = min(tb_cap, _round_up(B, sub))
    tb = max(sub, _round_up(tb, sub))

    n_tiles = _cdiv(B, tb)
    # Split the batch over cores only when batch traffic dominates (otherwise the
    # parallel work is carried by the Dout axis) and there is enough work.
    if num_cores >= 2 and not (weight_dominant and nj >= 2) and n_tiles >= num_cores:
        num_parallel = num_cores
    else:
        num_parallel = 1
    steps = _cdiv(n_tiles, num_parallel)

    # Padding-aware refinement: avoid paying full-price matmul+DMA on masked rows.
    if auto_tb and num_parallel * steps * tb - B > tb // 2:
        best_tb, best_pad = tb, num_parallel * steps * tb - B
        k0 = num_parallel * steps
        for k in range(k0, 4 * k0 + 1):
            cand = max(sub, _round_up(_cdiv(B, k), sub))
            st = _cdiv(_cdiv(B, cand), num_parallel)
            pad = num_parallel * st * cand - B
            if pad < best_pad:
                best_tb, best_pad = cand, pad
        tb = best_tb
        steps = _cdiv(_cdiv(B, tb), num_parallel)

    B_pad = num_parallel * steps * tb
    needs_mask = B_pad != B
    if needs_mask:
        f_s = jnp.pad(f_s, ((0, B_pad - B), (0, 0)))
        f_t = jnp.pad(f_t, ((0, B_pad - B), (0, 0)))

    # ---------------- VMEM limit ----------------
    needed = resident + tb * per_row
    vmem_limit = int(min(max(needed, 16 << 20), budget))

    # Weight spec: single-buffered when its block index never changes.
    if nj == 1:
        w_spec = pl.BlockSpec((Din, tn), lambda p, j, g: (0, j),
                              pipeline_mode=pl.Buffered(1))
    else:
        w_spec = pl.BlockSpec((Din, tn), lambda p, j, g: (0, j))

    kern = functools.partial(hint_loss_kernel, total_rows=B, tb=tb, steps=steps,
                             needs_mask=needs_mask)

    partials = pl.pallas_call(
        kern,
        out_shape=jax.ShapeDtypeStruct((num_parallel, nj, 8, 128), jnp.float32),
        grid_spec=pltpu.PrefetchScalarGridSpec(
            num_scalar_prefetch=0,
            grid=(num_parallel, nj, steps),
            in_specs=[
                pl.BlockSpec((tb, Din), lambda p, j, g: (p * steps + g, 0)),   # f_s
                w_spec,                                                        # W^T
                pl.BlockSpec((1, tn), lambda p, j, g: (0, j)),                 # bias
                pl.BlockSpec((tb, tn), lambda p, j, g: (p * steps + g, j)),    # f_t
            ],
            out_specs=pl.BlockSpec((1, 1, 8, 128), lambda p, j, g: (p, j, 0, 0)),
            scratch_shapes=[pltpu.VMEM((1, tn), jnp.float32)],
        ),
        compiler_params=pltpu.CompilerParams(
            dimension_semantics=("parallel", "parallel", "arbitrary"),
            vmem_limit_bytes=vmem_limit,
        ),
    )(f_s, w_t, b2, f_t)

    n_elems = B * Dout  # MSELoss 'mean' divides by all (unpadded) elements
    return jnp.sum(partials[:, :, 0, 0]) / n_elems


if __name__ == "__main__":
    # Small shapes consistent with the module (dim_in=2048, dim_out=128, scaled down).
    B, DIM_IN, DIM_OUT = 40, 256, 128

    key = jax.random.PRNGKey(0)
    k_fs, k_ft, k_w, k_b = jax.random.split(key, 4)

    f_s = jax.random.normal(k_fs, (B, DIM_IN), dtype=jnp.float32)
    f_t = jax.random.normal(k_ft, (B, DIM_OUT), dtype=jnp.float32)

    # Deterministic nn.Linear-style init: U(-1/sqrt(dim_in), 1/sqrt(dim_in)).
    bound = 1.0 / (DIM_IN ** 0.5)
    w = jax.random.uniform(k_w, (DIM_OUT, DIM_IN), jnp.float32, -bound, bound)
    b = jax.random.uniform(k_b, (DIM_OUT,), jnp.float32, -bound, bound)

    # Store the embedding weight as [dim_in, dim_out] once (no per-call transpose).
    w_t = jnp.asarray(w.T)

    ref = jnp.mean((f_s @ w.T + b - f_t) ** 2)

    # Path 1: multi-tile grid with a ragged batch tail (exercises the tail-gated
    # masking and cross-step accumulation).
    loss = jax.jit(functools.partial(hint_loss, tb=16))(f_s, f_t, w_t, b)
    jax.block_until_ready(loss)
    assert jnp.allclose(loss, ref, rtol=1e-5, atol=1e-5), (loss, ref)

    # Path 2: default tile selection (single tile, no masking).
    loss2 = jax.jit(hint_loss)(f_s[:16], f_t[:16], w_t, b)
    jax.block_until_ready(loss2)
    ref2 = jnp.mean((f_s[:16] @ w.T + b - f_t[:16]) ** 2)
    assert jnp.allclose(loss2, ref2, rtol=1e-5, atol=1e-5), (loss2, ref2)

    # Path 3: bf16 operands, f32 accumulation (memory-bound fast path).
    loss3 = jax.jit(functools.partial(hint_loss, compute_dtype=jnp.bfloat16))(
        f_s, f_t, w_t, b)
    jax.block_until_ready(loss3)
    assert jnp.allclose(loss3, ref, rtol=5e-2, atol=5e-2), (loss3, ref)

    print("KERNEL_OK")
</pallas_src>

<mosaic_0001>
module attributes {stable_mosaic.version = 11 : i64} {
  func.func @hint_loss_kernel(%arg0: i32, %arg1: i32, %arg2: i32, %arg3: memref<16x256xf32, #tpu.memory_space<vmem>>, %arg4: memref<256x128xf32, #tpu.memory_space<vmem>>, %arg5: memref<1x128xf32, #tpu.memory_space<vmem>>, %arg6: memref<16x128xf32, #tpu.memory_space<vmem>>, %arg7: memref<1x1x8x128xf32, #tpu.memory_space<vmem>>, %arg8: memref<1x128xf32, #tpu.memory_space<vmem>>) attributes {dimension_semantics = [#tpu.dimension_semantics<parallel>, #tpu.dimension_semantics<parallel>, #tpu.dimension_semantics<arbitrary>], iteration_bounds = array<i64: 1, 1, 3>, scalar_prefetch = 0 : i64, scratch_operands = 1 : i64, tpu.core_type = #tpu.core_type<tc>, window_params = [{transform_indices = @transform_0, window_bounds = array<i64: 16, 256>}, {pipeline_mode = #tpu.pipeline_mode<synchronous>, transform_indices = @transform_1, window_bounds = array<i64: 256, 128>}, {transform_indices = @transform_2, window_bounds = array<i64: 1, 128>}, {transform_indices = @transform_3, window_bounds = array<i64: 16, 128>}, {transform_indices = @transform_4, window_bounds = array<i64: 1, 1, 8, 128>}]} {
    %c0_i32 = arith.constant 0 : i32
    %0 = arith.cmpi eq, %arg2, %c0_i32 : i32
    %1 = arith.extui %0 : i1 to i32
    %c0_i32_0 = arith.constant 0 : i32
    %2 = arith.cmpi ne, %1, %c0_i32_0 : i32
    scf.if %2 {
      %cst_14 = arith.constant 0.000000e+00 : f32
      %26 = vector.broadcast %cst_14 : f32 to vector<1x128xf32>
      %c0_15 = arith.constant 0 : index
      %c0_16 = arith.constant 0 : index
      %27 = vector.load %arg8[%c0_15, %c0_16] : memref<1x128xf32, #tpu.memory_space<vmem>>, vector<1x128xf32>
      tpu.vector_store %arg8[%c0_15, %c0_16], %26 {strides = array<i32>} : memref<1x128xf32, #tpu.memory_space<vmem>>, vector<1x128xf32>,
    } else {
    }
    %c0 = arith.constant 0 : index
    %c0_1 = arith.constant 0 : index
    %3 = vector.load %arg3[%c0, %c0_1] : memref<16x256xf32, #tpu.memory_space<vmem>>, vector<16x256xf32>
    %c0_2 = arith.constant 0 : index
    %c0_3 = arith.constant 0 : index
    %4 = vector.load %arg4[%c0_2, %c0_3] : memref<256x128xf32, #tpu.memory_space<vmem>>, vector<256x128xf32>
    %cst = arith.constant dense<0.000000e+00> : vector<16x128xf32>
    %5 = tpu.matmul %3, %4, %cst {dimension_numbers = #tpu.dot_dimension_numbers<[1], [0], [0], [1], [0, 0, 1, 1], [], []>} : vector<16x256xf32>, vector<256x128xf32>, vector<16x128xf32> -> vector<16x128xf32>
    %c0_4 = arith.constant 0 : index
    %c0_5 = arith.constant 0 : index
    %6 = vector.load %arg5[%c0_4, %c0_5] : memref<1x128xf32, #tpu.memory_space<vmem>>, vector<1x128xf32>
    %7 = vector.broadcast %6 : vector<1x128xf32> to vector<16x128xf32>
    %8 = arith.addf %5, %7 : vector<16x128xf32>
    %c0_6 = arith.constant 0 : index
    %c0_7 = arith.constant 0 : index
    %9 = vector.load %arg6[%c0_6, %c0_7] : memref<16x128xf32, #tpu.memory_space<vmem>>, vector<16x128xf32>
    %10 = arith.subf %8, %9 : vector<16x128xf32>
    %11 = arith.mulf %10, %10 : vector<16x128xf32>
    %c3_i32 = arith.constant 3 : i32
    %12 = arith.muli %arg0, %c3_i32 : i32
    %13 = arith.addi %12, %arg2 : i32
    %c16_i32 = arith.constant 16 : i32
    %14 = arith.muli %13, %c16_i32 : i32
    %c16_i32_8 = arith.constant 16 : i32
    %15 = arith.addi %14, %c16_i32_8 : i32
    %c40_i32 = arith.constant 40 : i32
    %16 = arith.cmpi sgt, %15, %c40_i32 : i32
    %17 = arith.extui %16 : i1 to i32
    %c0_i32_9 = arith.constant 0 : i32
    %18 = arith.cmpi ne, %17, %c0_i32_9 : i32
    scf.if %18 {
      %26 = tpu.iota {dimensions = array<i32: 0>} : vector<16x128xi32>
      %27 = vector.broadcast %14 : i32 to vector<16x128xi32>
      %28 = arith.addi %27, %26 : vector<16x128xi32>
      %c40_i32_14 = arith.constant 40 : i32
      %29 = vector.broadcast %c40_i32_14 : i32 to vector<16x128xi32>
      %30 = arith.cmpi slt, %28, %29 : vector<16x128xi32>
      %cst_15 = arith.constant 0.000000e+00 : f32
      %31 = vector.broadcast %cst_15 : f32 to vector<16x128xf32>
      %32 = arith.select %30, %11, %31 : vector<16x128xi1>, vector<16x128xf32>
      %c0_16 = arith.constant 0 : index
      %c0_17 = arith.constant 0 : index
      %33 = vector.load %arg8[%c0_16, %c0_17] : memref<1x128xf32, #tpu.memory_space<vmem>>, vector<1x128xf32>
      %cst_18 = arith.constant dense<0.000000e+00> : vector<128xf32>
      %34 = vector.multi_reduction <add>, %32, %cst_18 [0] : vector<16x128xf32> to vector<128xf32>
      %35 = vector.shape_cast %34 : vector<128xf32> to vector<1x128xf32>
      %36 = arith.addf %33, %35 : vector<1x128xf32>
      %c0_19 = arith.constant 0 : index
      %c0_20 = arith.constant 0 : index
      %37 = vector.load %arg8[%c0_19, %c0_20] : memref<1x128xf32, #tpu.memory_space<vmem>>, vector<1x128xf32>
      tpu.vector_store %arg8[%c0_19, %c0_20], %36 {strides = array<i32>} : memref<1x128xf32, #tpu.memory_space<vmem>>, vector<1x128xf32>,
    } else {
    }
    %c16_i32_10 = arith.constant 16 : i32
    %19 = arith.addi %14, %c16_i32_10 : i32
    %c40_i32_11 = arith.constant 40 : i32
    %20 = arith.cmpi sle, %19, %c40_i32_11 : i32
    %21 = arith.extui %20 : i1 to i32
    %c0_i32_12 = arith.constant 0 : i32
    %22 = arith.cmpi ne, %21, %c0_i32_12 : i32
    scf.if %22 {
      %c0_14 = arith.constant 0 : index
      %c0_15 = arith.constant 0 : index
      %26 = vector.load %arg8[%c0_14, %c0_15] : memref<1x128xf32, #tpu.memory_space<vmem>>, vector<1x128xf32>
      %cst_16 = arith.constant dense<0.000000e+00> : vector<128xf32>
      %27 = vector.multi_reduction <add>, %11, %cst_16 [0] : vector<16x128xf32> to vector<128xf32>
      %28 = vector.shape_cast %27 : vector<128xf32> to vector<1x128xf32>
      %29 = arith.addf %26, %28 : vector<1x128xf32>
      %c0_17 = arith.constant 0 : index
      %c0_18 = arith.constant 0 : index
      %30 = vector.load %arg8[%c0_17, %c0_18] : memref<1x128xf32, #tpu.memory_space<vmem>>, vector<1x128xf32>
      tpu.vector_store %arg8[%c0_17, %c0_18], %29 {strides = array<i32>} : memref<1x128xf32, #tpu.memory_space<vmem>>, vector<1x128xf32>,
    } else {
    }
    %c2_i32 = arith.constant 2 : i32
    %23 = arith.cmpi eq, %arg2, %c2_i32 : i32
    %24 = arith.extui %23 : i1 to i32
    %c0_i32_13 = arith.constant 0 : i32
    %25 = arith.cmpi ne, %24, %c0_i32_13 : i32
    scf.if %25 {
      %c0_14 = arith.constant 0 : index
      %c0_15 = arith.constant 0 : index
      %26 = vector.load %arg8[%c0_14, %c0_15] : memref<1x128xf32, #tpu.memory_space<vmem>>, vector<1x128xf32>
      %27 = vector.shape_cast %26 : vector<1x128xf32> to vector<1x1x128xf32>
      %cst_16 = arith.constant dense<0.000000e+00> : vector<1xf32>
      %28 = vector.multi_reduction <add>, %27, %cst_16 [1, 2] : vector<1x1x128xf32> to vector<1xf32>
      %29 = vector.shape_cast %28 : vector<1xf32> to vector<1x1x1xf32>
      %30 = vector.extract %29[0, 0, 0] : f32 from vector<1x1x1xf32>
      %cst_17 = arith.constant 0.000000e+00 : f32
      %31 = vector.broadcast %cst_17 : f32 to vector<1x1x8x128xf32>
      %32 = vector.broadcast %30 : f32 to vector<1x1x8x128xf32>
      %33 = arith.addf %31, %32 : vector<1x1x8x128xf32>
      %c0_18 = arith.constant 0 : index
      %c0_19 = arith.constant 0 : index
      %c0_20 = arith.constant 0 : index
      %c0_21 = arith.constant 0 : index
      %34 = vector.load %arg7[%c0_18, %c0_19, %c0_20, %c0_21] : memref<1x1x8x128xf32, #tpu.memory_space<vmem>>, vector<1x1x8x128xf32>
      tpu.vector_store %arg7[%c0_18, %c0_19, %c0_20, %c0_21], %33 {strides = array<i32>} : memref<1x1x8x128xf32, #tpu.memory_space<vmem>>, vector<1x1x8x128xf32>,
    } else {
    }
    return
  }
  func.func @transform_0(%arg0: i32, %arg1: i32, %arg2: i32) -> (i32, i32) {
    %c3_i32 = arith.constant 3 : i32
    %0 = arith.muli %arg0, %c3_i32 : i32
    %1 = arith.addi %0, %arg2 : i32
    %c0_i32 = arith.constant 0 : i32
    %c0_i32_0 = arith.constant 0 : i32
    return %1, %c0_i32 : i32, i32
  }
  func.func @transform_1(%arg0: i32, %arg1: i32, %arg2: i32) -> (i32, i32) {
    %c0_i32 = arith.constant 0 : i32
    %c0_i32_0 = arith.constant 0 : i32
    return %c0_i32, %arg1 : i32, i32
  }
  func.func @transform_2(%arg0: i32, %arg1: i32, %arg2: i32) -> (i32, i32) {
    %c0_i32 = arith.constant 0 : i32
    %c0_i32_0 = arith.constant 0 : i32
    return %c0_i32, %arg1 : i32, i32
  }
  func.func @transform_3(%arg0: i32, %arg1: i32, %arg2: i32) -> (i32, i32) {
    %c3_i32 = arith.constant 3 : i32
    %0 = arith.muli %arg0, %c3_i32 : i32
    %1 = arith.addi %0, %arg2 : i32
    %c0_i32 = arith.constant 0 : i32
    return %1, %arg1 : i32, i32
  }
  func.func @transform_4(%arg0: i32, %arg1: i32, %arg2: i32) -> (i32, i32, i32, i32) {
    %c0_i32 = arith.constant 0 : i32
    %c0_i32_0 = arith.constant 0 : i32
    %c0_i32_1 = arith.constant 0 : i32
    return %arg0, %arg1, %c0_i32, %c0_i32_0 : i32, i32, i32, i32
  }
}

</mosaic_0001>

<bundles_post_ra>
// kernel: hint_loss.1
= control target key start
LH: loop header
LB: loop body
LE: loop exit
PB: predicated region body
PF: predicated region fallthrough
CT: control target
= control target key end

     0   :  { %s792_s15 = smov 0   ;;  %s794_s16 = smov 0   ;;  %s947_s0 = inlined_call_operand.vmem [shape: f32[48,256], index: 0, kind: input, shape index: {}]   ;;  %s948_s1 = inlined_call_operand.vmem [shape: f32[256,128], index: 1, kind: input, shape index: {}]   ;;  %s949_s2 = inlined_call_operand.vmem [shape: f32[1,128], index: 2, kind: input, shape index: {}]   ;;  %s950_s3 = inlined_call_operand.vmem [shape: f32[48,128], index: 3, kind: input, shape index: {}]   ;;  %s951_s4 = inlined_call_operand.vmem [shape: f32[1,1,8,128], index: 4, kind: output, shape index: {}]  }
   0x1   :  { %s796_s17 = smov 0  }
   0x2 LB: > { %s26_s18 = sadd.s32 1, %s760_s16  ;;  %p629_p0 = scmp.ge.s32.totalorder %s764_s17, 1  ;;  %s764_s17 = sphi %s796_s17, %s14_s17   ;;  %s760_s16 = sphi %s794_s16, %s953_s16   ;;  %s756_s15 = sphi %s792_s15, %s952_s15  }
   0x3   : > { %p27_p1 = scmp.ge.s32.totalorder %s26_s18, 3  ;;  %p234_p2 = scmp.lt.s32.totalorder %s764_s17, 4 }
   0x5   : > { %s955_s18 = smov (%p27_p1, %s26_s18), 0  ;;  %p235_p3 = pnand %p629_p0, %p234_p2 }
   0x6   : > { %s630_s19 = sshll.u32 (!%p235_p3), %s756_s15, 1  ;;  %p635_p5 = scmp.ne.s32.totalorder (!%p235_p3), %s756_s15, 0 }
   0x7   : > { %238 = sbr.rel (%p235_p3) target bundleno = 517 (0x205), region = 36  ;;  %p285_p4 = scmp.lt.s32.totalorder (!%p235_p3), %s630_s19, 5 }
   0xc   : > { %s957_s19 = smov (!%p285_p4, %s630_s19), 5  ;;  %323 = sbr.rel (%p635_p5) target bundleno = 19 (0x13), region = 40 }
   0xd   : > { %s644_s20 = sshll.u32 %s957_s19, 4  ;;  %s634_s21 = sshll.u32 %s957_s19, 3 }
   0xe   : > { %s816_s24 = scalar_lea.vmem %s947_s0, %s644_s20  ;;  %s821_s27 = scalar_lea.vmem %s950_s3, %s634_s21 }
  0x11   : > { %v766_v0 = vmov 0.0  }
  0x12   : > { %324 = vst [vmem:[#allocation2] sm:$0x1] %v766_v0 }
  0x13 PF: > { %v360_v1 = vld [vmem:[%s948_s1 + $0xf8] sm:$0xff]  ;;  %v359_v3 = vld [vmem:[%s948_s1 + $0xf0] sm:$0xff]  ;;  %v358_v5 = vld [vmem:[%s948_s1 + $0xe8] sm:$0xff]  ;;  %s637_s6 = sshll.u32 %s756_s15, 4 }
  0x14   : > { %v344_v2 = vld [vmem:[%s948_s1 + $0x78] sm:$0xff]  ;;  %645 = vmatprep.subr.mxu0 %v360_v1  ;;  %683 = vmatprep.subr.mxu1 %v360_v1  ;;  %v343_v4 = vld [vmem:[%s948_s1 + $0x70] sm:$0xff]  ;;  %v342_v6 = vld [vmem:[%s948_s1 + $0x68] sm:$0xff]  ;;  %s925_s7 = sadd.s32 16, %s637_s6 }
  0x15   : > { %646 = vmatpush3.msra.mxu0 %v344_v2  ;;  %699 = vmatpush3.msra.mxu1 %v344_v2  ;;  %v357_v7 = vld [vmem:[%s948_s1 + $0xe0] sm:$0xff]  ;;  %v356_v9 = vld [vmem:[%s948_s1 + $0xd8] sm:$0xff]  ;;  %v355_v11 = vld [vmem:[%s948_s1 + $0xd0] sm:$0xff]  ;;  %p638_p6 = scmp.le.s32.totalorder %s925_s7, 40 }
  0x16   : > { %647 = vmatprep.subr.mxu0 %v359_v3  ;;  %684 = vmatprep.subr.mxu1 %v359_v3  ;;  %v341_v8 = vld [vmem:[%s948_s1 + $0x60] sm:$0xff]  ;;  %v340_v10 = vld [vmem:[%s948_s1 + $0x58] sm:$0xff]  ;;  %v339_v12 = vld [vmem:[%s948_s1 + $0x50] sm:$0xff] }
  0x17   : > { %648 = vmatpush3.msra.mxu0 %v343_v4  ;;  %700 = vmatpush3.msra.mxu1 %v343_v4  ;;  %v354_v13 = vld [vmem:[%s948_s1 + $0xc8] sm:$0xff]  ;;  %v353_v15 = vld [vmem:[%s948_s1 + $0xc0] sm:$0xff]  ;;  %v352_v17 = vld [vmem:[%s948_s1 + $0xb8] sm:$0xff] }
  0x18   : > { %649 = vmatprep.subr.mxu0 %v358_v5  ;;  %685 = vmatprep.subr.mxu1 %v358_v5  ;;  %v338_v14 = vld [vmem:[%s948_s1 + $0x48] sm:$0xff]  ;;  %v337_v16 = vld [vmem:[%s948_s1 + $0x40] sm:$0xff]  ;;  %v336_v18 = vld [vmem:[%s948_s1 + $0x38] sm:$0xff] }
  0x19   : > { %650 = vmatpush3.msra.mxu0 %v342_v6  ;;  %701 = vmatpush3.msra.mxu1 %v342_v6  ;;  %v351_v19 = vld [vmem:[%s948_s1 + $0xb0] sm:$0xff]  ;;  %v350_v21 = vld [vmem:[%s948_s1 + $0xa8] sm:$0xff]  ;;  %v349_v23 = vld [vmem:[%s948_s1 + $0xa0] sm:$0xff] }
  0x1a   : > { %651 = vmatprep.subr.mxu0 %v357_v7  ;;  %686 = vmatprep.subr.mxu1 %v357_v7  ;;  %v335_v20 = vld [vmem:[%s948_s1 + $0x30] sm:$0xff]  ;;  %v334_v22 = vld [vmem:[%s948_s1 + $0x28] sm:$0xff]  ;;  %v333_v24 = vld [vmem:[%s948_s1 + $0x20] sm:$0xff] }
  0x1b   : > { %652 = vmatpush3.msra.mxu0 %v341_v8  ;;  %702 = vmatpush3.msra.mxu1 %v341_v8  ;;  %v348_v25 = vld [vmem:[%s948_s1 + $0x98] sm:$0xff]  ;;  %v347_v27 = vld [vmem:[%s948_s1 + $0x90] sm:$0xff]  ;;  %v346_v29 = vld [vmem:[%s948_s1 + $0x88] sm:$0xff] }
  0x1c   : > { %653 = vmatprep.subr.mxu0 %v356_v9  ;;  %687 = vmatprep.subr.mxu1 %v356_v9  ;;  %v332_v26 = vld [vmem:[%s948_s1 + $0x18] sm:$0xff]  ;;  %v331_v28 = vld [vmem:[%s948_s1 + $0x10] sm:$0xff]  ;;  %v330_v30 = vld [vmem:[%s948_s1 + $0x8] sm:$0xff] }
  0x1d   : > { %654 = vmatpush3.msra.mxu0 %v340_v10  ;;  %703 = vmatpush3.msra.mxu1 %v340_v10  ;;  %v345_v31 = vld [vmem:[%s948_s1 + $0x80] sm:$0xff]  ;;  %v326_v33 = vld [vmem:[%s816_s24 + $0x8] sm:$0xff]  ;;  %v328_v34 = vld [vmem:[%s816_s24 + $0x18] sm:$0xff] }
  0x1e   : > { %655 = vmatprep.subr.mxu0 %v355_v11  ;;  %688 = vmatprep.subr.mxu1 %v355_v11  ;;  %v329_v32 = vld [vmem:[%s948_s1] sm:$0xff]  ;;  %v327_v36 = vld [vmem:[%s816_s24 + $0x10] sm:$0xff]  ;;  %v444_v45 = vld [vmem:[%s821_s27 + $0x8] sm:$0xff] }
  0x1f   : > { %656 = vmatpush3.msra.mxu0 %v339_v12  ;;  %704 = vmatpush3.msra.mxu1 %v339_v12  ;;  %v325_v35 = vld [vmem:[%s816_s24] sm:$0xff] }
  0x20   : > { %657 = vmatprep.subr.mxu0 %v354_v13  ;;  %689 = vmatprep.subr.mxu1 %v354_v13  ;;  %v636_v39 = vld [vmem:[%s949_s2] ss:$0 sm:$0xff] }
  0x21   : > { %658 = vmatpush3.msra.mxu0 %v338_v14  ;;  %705 = vmatpush3.msra.mxu1 %v338_v14  ;;  %v443_v44 = vld [vmem:[%s821_s27] sm:$0xff] }
  0x22   : > { %659 = vmatprep.subr.mxu0 %v353_v15  ;;  %690 = vmatprep.subr.mxu1 %v353_v15 }
  0x23   : > { %660 = vmatpush3.msra.mxu0 %v337_v16  ;;  %706 = vmatpush3.msra.mxu1 %v337_v16 }
  0x24   : > { %661 = vmatprep.subr.mxu0 %v352_v17  ;;  %691 = vmatprep.subr.mxu1 %v352_v17 }
  0x25   : > { %662 = vmatpush3.msra.mxu0 %v336_v18  ;;  %707 = vmatpush3.msra.mxu1 %v336_v18 }
  0x26   : > { %663 = vmatprep.subr.mxu0 %v351_v19  ;;  %692 = vmatprep.subr.mxu1 %v351_v19 }
  0x27   : > { %664 = vmatpush3.msra.mxu0 %v335_v20  ;;  %708 = vmatpush3.msra.mxu1 %v335_v20 }
  0x28   : > { %665 = vmatprep.subr.mxu0 %v350_v21  ;;  %693 = vmatprep.subr.mxu1 %v350_v21 }
  0x29   : > { %666 = vmatpush3.msra.mxu0 %v334_v22  ;;  %709 = vmatpush3.msra.mxu1 %v334_v22 }
  0x2a   : > { %667 = vmatprep.subr.mxu0 %v349_v23  ;;  %694 = vmatprep.subr.mxu1 %v349_v23 }
  0x2b   : > { %668 = vmatpush3.msra.mxu0 %v333_v24  ;;  %710 = vmatpush3.msra.mxu1 %v333_v24 }
  0x2c   : > { %669 = vmatprep.subr.mxu0 %v348_v25  ;;  %695 = vmatprep.subr.mxu1 %v348_v25 }
  0x2d   : > { %670 = vmatpush3.msra.mxu0 %v332_v26  ;;  %711 = vmatpush3.msra.mxu1 %v332_v26 }
  0x2e   : > { %671 = vmatprep.subr.mxu0 %v347_v27  ;;  %696 = vmatprep.subr.mxu1 %v347_v27 }
  0x2f   : > { %672 = vmatpush3.msra.mxu0 %v331_v28  ;;  %712 = vmatpush3.msra.mxu1 %v331_v28 }
  0x30   : > { %673 = vmatprep.subr.mxu0 %v346_v29  ;;  %697 = vmatprep.subr.mxu1 %v346_v29 }
  0x31   : > { %674 = vmatpush3.msra.mxu0 %v330_v30  ;;  %713 = vmatpush3.msra.mxu1 %v330_v30 }
  0x32   : > { %675 = vmatprep.subr.mxu0 %v345_v31  ;;  %698 = vmatprep.subr.mxu1 %v345_v31 }
  0x33   : > { %676 = vmatpush3.msra.mxu0 %v329_v32  ;;  %714 = vmatpush3.msra.mxu1 %v329_v32 }
  0x34   : > { %432 = vmatprep.mubr.f32.mxu0 %v326_v33  ;;  %437 = vmatprep.mubr.f32.mxu1 %v328_v34 }
  0x35   : > { %433 = vmatmul.mubr.f32.vlgmr.msra.gmra.mxu0 %v325_v35  ;;  %438 = vmatmul.mubr.f32.vlgmr.msra.gmra.mxu1 %v327_v36 }
  0xf5   : > { %v677_v37 = vpop.f32.mrf.mxu0  ;;  %v680_v38 = vpop.f32.mrf.mxu1 }
  0xf7   : > { %v678_v40 = vpop.f32.mrf.mxu0  ;;  %v681_v41 = vpop.f32.mrf.mxu1 }
  0xf8   : > { %v679_v42 = vadd.f32 %v678_v40, %v677_v37  ;;  %v682_v43 = vadd.f32 %v681_v41, %v680_v38 }
  0xfa   : > { %v435_v46 = vadd.f32 %v679_v42, %v636_v39  ;;  %v440_v47 = vadd.f32 %v682_v43, %v636_v39  ;;  %456 = sbr.rel (%p638_p6) target bundleno = 282 (0x11a), region = 44 }
  0xfc   : > { %v445_v48 = vsub.f32 %v435_v46, %v443_v44  ;;  %v446_v49 = vsub.f32 %v440_v47, %v444_v45 }
  0xfe   : > { %v447_v50 = vmul.f32 %v445_v48, %v445_v48  ;;  %v448_v51 = vmul.f32 %v446_v49, %v446_v49 }
  0xff   : > { %v457_v52 = vlaneseq  ;;  %v460_v53 = vstv %s637_s6  ;;  %v467_v2 = vld [vmem:[#allocation2] sm:$0x1] }
 0x101   : > { %v458_v54 = vshrl.u32 %v457_v52, 7 }
 0x103   : > { %v459_v55 = vadd.s32 8, %v458_v54  ;;  %v461_v56 = vadd.s32 %v460_v53, %v458_v54 }
 0x105   : > { %v462_v57 = vadd.s32 %v460_v53, %v459_v55  ;;  %vm463_vm0 = vcmp.lt.s32.totalorder %v461_v56, 40 }
 0x106   : > { %v465_v58 = vsel %vm463_vm0, %v447_v50, 0.0 }
 0x107   : > { %vm464_vm1 = vcmp.lt.s32.totalorder %v462_v57, 40 }
 0x108   : > { %v466_v59 = vsel %vm464_vm1, %v448_v51, 0.0 }
 0x109   : > { %v468_v60 = vadd.f32 %v466_v59, %v465_v58 }
 0x10b   : > { %v469_v61 = vrot.slane %v468_v60, 4 }
 0x10d   : > { %v470_v62 = vadd.f32 %v469_v61, %v468_v60 }
 0x10f   : > { %v471_v63 = vrot.slane %v470_v62, 2 }
 0x111   : > { %v472_v0 = vadd.f32 %v471_v63, %v470_v62 }
 0x113   : > { %v473_v1 = vrot.slane %v472_v0, 1 }
 0x115   : > { %v474_v3 = vadd.f32 %v473_v1, %v472_v0 }
 0x117   : > { %v475_v4 = vadd.f32 %v474_v3, %v467_v2 }
 0x119   : > { %476 = vst [vmem:[#allocation2] sm:$0x1] %v475_v4 }
 0x11a PF: > { %p639_p7 = scmp.gt.s32.totalorder %s925_s7, 40 }
 0x11c   : > { %480 = sbr.rel (%p639_p7) target bundleno = 306 (0x132), region = 48 }
 0x121   : > { %v482_v5 = vadd.f32 %v448_v51, %v447_v50  ;;  %v481_v11 = vld [vmem:[#allocation2] sm:$0x1] }
 0x123   : > { %v483_v6 = vrot.slane %v482_v5, 4 }
 0x125   : > { %v484_v7 = vadd.f32 %v483_v6, %v482_v5 }
 0x127   : > { %v485_v8 = vrot.slane %v484_v7, 2 }
 0x129   : > { %v486_v9 = vadd.f32 %v485_v8, %v484_v7 }
 0x12b   : > { %v487_v10 = vrot.slane %v486_v9, 1 }
 0x12d   : > { %v488_v12 = vadd.f32 %v487_v10, %v486_v9 }
 0x12f   : > { %v489_v13 = vadd.f32 %v488_v12, %v481_v11 }
 0x131   : > { %490 = vst [vmem:[#allocation2] sm:$0x1] %v489_v13 }
 0x132 PF: > { %p640_p8 = scmp.ne.s32.totalorder %s756_s15, 2 }
 0x134   : > { %494 = sbr.rel (%p640_p8) target bundleno = 517 (0x205), region = 52 }
 0x139   : > { %v495_v14 = vld [vmem:[#allocation2] sm:$0x1]  ;;  %vm496_vm2 = vcmask 1040384  }
 0x13a   : > { %v497_v15 = vsel %vm496_vm2, %v495_v14, 0.0 }
 0x13b   : > { %498 = vadd.xlane.f32.xlu0 %v497_v15 }
 0x1c4   : > { %v499_v16 = vpop.xlane.xlu0 %498 }
 0x1c5   : > { %v500_v17 = vrot.slane %v499_v16, 4 }
 0x1c7   : > { %v501_v18 = vadd.f32 %v500_v17, %v499_v16 }
 0x1c9   : > { %v502_v19 = vrot.slane %v501_v18, 2 }
 0x1cb   : > { %v503_v20 = vadd.f32 %v502_v19, %v501_v18 }
 0x1cd   : > { %v504_v21 = vrot.slane %v503_v20, 1 }
 0x1cf   : > { %v505_v22 = vadd.f32 %v504_v21, %v503_v20 }
 0x1d1   : > { %715 = vpush %v505_v22 }
 0x202   : > { %s716_s24 = spop %715 }
 0x203   : > { %v507_v23 = vstv %s716_s24 }
 0x204   : > { %509 = vst [vmem:[%s951_s4] sm:$0xff] %v507_v23 }
 0x205 PF: > { %s14_s17 = sadd.s32 1, %s764_s17   ;;  %s952_s15 = smov %s760_s16 }
 0x206   : > { %p11_p9 = scmp.ge.s32.totalorder %s14_s17, 5   ;;  %s953_s16 = smov %s955_s18 }
 0x208   :  { %13 = sbr.rel (!%p11_p9) target bundleno = 2 (0x2), region = 91 }

</bundles_post_ra>
